<compile_context>
chip_gen: v5e
topology: v5e:2x2
jax: 0.10.0
libtpu: 0.0.40
codegen_flags: <defaults>
</compile_context>

<pallas_src>
import functools
import math

import jax
import jax.numpy as jnp
from jax import lax
from jax.experimental import pallas as pl
from jax.experimental.pallas import tpu as pltpu


def _attention_kernel(q_ref, k_ref, v_ref, out_ref, *, c_block, exp_dtype):
    # q_ref:   (C_pad, H)  bf16, pre-scaled by 1/sqrt(H), DMA'd once (const map)
    # k_ref:   (S, H)      bf16 (unit batch dim squeezed)
    # v_ref:   (S, H)      bf16
    # out_ref: (c_block, H) f32
    c0 = pl.multiple_of(pl.program_id(1) * c_block, c_block)
    q = q_ref[pl.ds(c0, c_block), :]                          # (c_block, H)

    # Q @ K^T: contract last dims directly -> no materialized transpose of K.
    e = lax.dot_general(q, k_ref[...], (((1,), (1,)), ((), ())),
                        preferred_element_type=jnp.float32)    # (c_block, S)

    # Softmax over the sequence axis; max-subtraction in f32, exp in exp_dtype
    # (bf16 on v6e/v7x EUP, f32 on v5e), denominator accumulated in f32.
    m = jnp.max(e, axis=-1, keepdims=True)
    p = jnp.exp((e - m).astype(exp_dtype))                     # (c_block, S)
    denom = jnp.sum(p, axis=-1, keepdims=True, dtype=jnp.float32)

    # Un-normalized PV matmul first, then 1/denom on the smaller (c_block, H)
    # result.  Exact reciprocal: only c_block values, negligible EUP cost.
    ctx = jnp.dot(p.astype(v_ref.dtype), v_ref[...],
                  preferred_element_type=jnp.float32)          # (c_block, H)
    out_ref[...] = (ctx * pl.reciprocal(denom, approx=False)).astype(out_ref.dtype)


def weighted_label_attention(k_in, v_in, label_emb, w_map, b_map, q_rdm_w,
                             alphas, *, c_tile=None,
                             matmul_dtype=jnp.bfloat16,
                             vmem_limit_bytes=None):
    """k_in, v_in: (B, S, H); returns (B, C, H) context vectors (f32)."""
    B, S, H = k_in.shape
    C, E = label_emb.shape
    assert w_map.shape == (H, E)
    assert q_rdm_w.shape == (C, H)

    kind = jax.devices()[0].device_kind.lower()
    old_gen = any(v in kind for v in ("v2", "v3", "v4", "v5"))  # no bf16 EUP
    is_v7 = "v7" in kind
    itemsize = jnp.dtype(matmul_dtype).itemsize

    # Per-generation class tile: v5e's MXU is 128-wide, so 256 buys nothing and
    # doubles the (c_block, S) f32 temporaries; 128 also fits its tighter VMEM.
    if c_tile is None:
        c_tile = 128 if (old_gen or is_v7) else 256

    # ---- Hoisted, batch-invariant Q construction (fused by XLA) -------------
    # Conv1d(E->H, k=1) on label_emb.T, transposed back == label_emb @ W^T + b.
    # 1/sqrt(H) is folded in here and Q is emitted in the matmul dtype, so the
    # kernel does no per-step scaling or casting of Q.
    alphas2 = alphas.reshape(C, 1).astype(jnp.float32)
    q_pt = label_emb.astype(jnp.float32) @ w_map.T.astype(jnp.float32)
    q_pt = q_pt + b_map.reshape(1, H).astype(jnp.float32)
    q = alphas2 * q_rdm_w.astype(jnp.float32) + (1.0 - alphas2) * q_pt  # (C, H)
    q = (q * (1.0 / math.sqrt(H))).astype(matmul_dtype)

    # ---- Class tiling: pad C so the in-kernel dynamic slice is in bounds ----
    if C <= c_tile:
        c_block = C                              # equals full dim -> legal
    else:
        c_block = c_tile
        assert c_block % 8 == 0, "class tile must be a multiple of 8"
    n_ct = pl.cdiv(C, c_block)
    c_pad = n_ct * c_block
    if c_pad != C:
        q = jnp.pad(q, ((0, c_pad - C), (0, 0)))  # zero rows; sliced off below

    # ---- K/V narrowed once, outside the kernel ------------------------------
    k_mm = k_in.astype(matmul_dtype)
    v_mm = v_in.astype(matmul_dtype)

    # exp dtype: bf16 EUP only exists on v6e/v7x; only worth it while the EUP
    # (not the MXU) is the binding slot, i.e. small/medium H.
    exp_dtype = jnp.float32 if (old_gen or H > 256) else jnp.bfloat16

    # ---- VMEM budget (explicit; capped below v7x's 64 MiB physical) ---------
    if vmem_limit_bytes is None:
        kv_bytes = 2 * 2 * S * H * itemsize          # K + V, double-buffered
        q_bytes = c_pad * H * itemsize               # resident once
        out_bytes = 2 * c_block * H * 4              # double-buffered f32 out
        tmp_bytes = 12 * c_block * S * 4             # logits / exp temporaries
        need = kv_bytes + q_bytes + out_bytes + tmp_bytes + (8 << 20)
        cap = (56 << 20) if is_v7 else (100 << 20)
        vmem_limit_bytes = int(min(max(need, 32 << 20), cap))

    # K/V single-buffering on v7x when the resident footprint gets large: they
    # only change once per batch (n_ct inner steps), so the second buffer hides
    # a single DMA per batch at double the footprint.
    kv_kwargs = {}
    if is_v7 and (2 * 2 * S * H * itemsize) > (12 << 20):
        kv_kwargs["pipeline_mode"] = pl.Buffered(1)

    # Megacore: shard the batch axis when possible (disjoint K/V per core);
    # only shard classes when there is a single batch element.
    if B >= 2:
        dim_sem = ("parallel", "arbitrary")
    else:
        dim_sem = ("arbitrary", "parallel")

    cost = pl.CostEstimate(
        flops=int(4 * B * c_pad * S * H),                      # QK^T + PV
        transcendentals=int(B * c_pad * S),                    # exp
        bytes_accessed=int(B * 2 * S * H * itemsize            # K + V read
                           + c_pad * H * itemsize              # Q read (once)
                           + B * c_pad * H * 4))               # output write

    kernel = functools.partial(_attention_kernel, c_block=c_block,
                               exp_dtype=exp_dtype)

    out = pl.pallas_call(
        kernel,
        out_shape=jax.ShapeDtypeStruct((B, c_pad, H), jnp.float32),
        grid_spec=pltpu.PrefetchScalarGridSpec(
            num_scalar_prefetch=0,
            grid=(B, n_ct),               # B outer: K/V stay resident over c
            in_specs=[
                # Whole (padded) Q, constant block index -> DMA'd once.
                pl.BlockSpec((c_pad, H), lambda b, c: (0, 0)),
                # K, V: one batch element per step; unit batch dim squeezed.
                pl.BlockSpec((pl.Squeezed(), S, H), lambda b, c: (b, 0, 0),
                             **kv_kwargs),
                pl.BlockSpec((pl.Squeezed(), S, H), lambda b, c: (b, 0, 0),
                             **kv_kwargs),
            ],
            out_specs=pl.BlockSpec((pl.Squeezed(), c_block, H),
                                   lambda b, c: (b, c, 0)),
        ),
        compiler_params=pltpu.CompilerParams(
            dimension_semantics=dim_sem,
            vmem_limit_bytes=vmem_limit_bytes),
        cost_estimate=cost,
    )(q, k_mm, v_mm)

    if c_pad != C:
        out = out[:, :C, :]
    return out


def _reference(k_in, v_in, label_emb, w_map, b_map, q_rdm_w, alphas):
    H = k_in.shape[-1]
    q_pt = label_emb @ w_map.T + b_map[None, :]
    q = alphas * q_rdm_w + (1.0 - alphas) * q_pt
    e = jnp.einsum("ch,bsh->bcs", q, k_in) / jnp.sqrt(jnp.float32(H))
    a = jax.nn.softmax(e, axis=2)
    return jnp.einsum("bcs,bsh->bch", a, v_in)


if __name__ == "__main__":
    # Small shapes consistent with the module.
    batch = 2
    seq = 8
    hidden_dim = 32
    embedding_dim = 16
    num_classes = 8

    key = jax.random.PRNGKey(0)
    keys = jax.random.split(key, 7)

    # Deterministic synthetic parameters (shapes from __init__).
    # label_embedding_matrix -> Q_pt.weight : (num_classes, embedding_dim)
    label_emb = jax.random.normal(keys[0], (num_classes, embedding_dim),
                                  jnp.float32)
    # _mapping_layer: Conv1d(embedding_dim -> hidden_dim, k=1)
    w_map = jax.random.normal(keys[1], (hidden_dim, embedding_dim),
                              jnp.float32) * 0.1
    b_map = jax.random.normal(keys[2], (hidden_dim,), jnp.float32) * 0.01
    # Q_rdm: Linear(hidden_dim -> num_classes), xavier-ish uniform
    lim = math.sqrt(6.0 / (hidden_dim + num_classes))
    q_rdm_w = jax.random.uniform(keys[3], (num_classes, hidden_dim),
                                 jnp.float32, -lim, lim)
    # alphas ~ U[0,1), shape (num_classes, 1)
    alphas = jax.random.uniform(keys[4], (num_classes, 1), jnp.float32)

    # Forward inputs: K, V hidden representations, (B, S, H)
    k_in = jax.random.normal(keys[5], (batch, seq, hidden_dim), jnp.float32)
    v_in = jax.random.normal(keys[6], (batch, seq, hidden_dim), jnp.float32)

    out = weighted_label_attention(k_in, v_in, label_emb, w_map, b_map,
                                   q_rdm_w, alphas)
    out = jax.block_until_ready(out)

    ref = _reference(k_in, v_in, label_emb, w_map, b_map, q_rdm_w,
                     alphas.reshape(num_classes, 1))
    assert out.shape == (batch, num_classes, hidden_dim)
    # bf16 MXU operands (+ bf16 exp on v6e/v7x) -> looser tolerance than f32.
    assert jnp.allclose(out, ref, atol=4e-2, rtol=4e-2), (
        float(jnp.max(jnp.abs(out - ref))))

    print("KERNEL_OK")
</pallas_src>

<mosaic_0001>
module attributes {stable_mosaic.version = 11 : i64} {
  func.func @_attention_kernel(%arg0: i32, %arg1: i32, %arg2: memref<8x32xbf16, #tpu.memory_space<vmem>>, %arg3: memref<1x8x32xbf16, #tpu.memory_space<vmem>>, %arg4: memref<1x8x32xbf16, #tpu.memory_space<vmem>>, %arg5: memref<1x8x32xf32, #tpu.memory_space<vmem>>) attributes {dimension_semantics = [#tpu.dimension_semantics<parallel>, #tpu.dimension_semantics<arbitrary>], iteration_bounds = array<i64: 2, 1>, scalar_prefetch = 0 : i64, scratch_operands = 0 : i64, tpu.core_type = #tpu.core_type<tc>, window_params = [{pipeline_mode = #tpu.pipeline_mode<synchronous>, transform_indices = @transform_0, window_bounds = array<i64: 8, 32>}, {transform_indices = @transform_1, window_bounds = array<i64: 1, 8, 32>}, {transform_indices = @transform_2, window_bounds = array<i64: 1, 8, 32>}, {transform_indices = @transform_3, window_bounds = array<i64: 1, 8, 32>}]} {
    %c8_i32 = arith.constant 8 : i32
    %0 = arith.muli %arg1, %c8_i32 : i32
    %1 = tpu.assume_multiple %0, 8 : i32
    %2 = arith.index_cast %1 : i32 to index
    %c0 = arith.constant 0 : index
    %3 = vector.load %arg2[%2, %c0] : memref<8x32xbf16, #tpu.memory_space<vmem>>, vector<8x32xbf16>
    %c0_0 = arith.constant 0 : index
    %c0_1 = arith.constant 0 : index
    %c0_2 = arith.constant 0 : index
    %4 = vector.load %arg3[%c0_0, %c0_1, %c0_2] : memref<1x8x32xbf16, #tpu.memory_space<vmem>>, vector<1x8x32xbf16>
    %5 = vector.shape_cast %4 : vector<1x8x32xbf16> to vector<8x32xbf16>
    %cst = arith.constant dense<0.000000e+00> : vector<8x8xf32>
    %6 = tpu.matmul %3, %5, %cst {dimension_numbers = #tpu.dot_dimension_numbers<[1], [1], [0], [0], [0, 0, 1, 0], [], []>} : vector<8x32xbf16>, vector<8x32xbf16>, vector<8x8xf32> -> vector<8x8xf32>
    %cst_3 = arith.constant dense<0xFF800000> : vector<8xf32>
    %7 = vector.multi_reduction <maximumf>, %6, %cst_3 [1] : vector<8x8xf32> to vector<8xf32>
    %8 = vector.shape_cast %7 : vector<8xf32> to vector<8x1xf32>
    %9 = vector.broadcast %8 : vector<8x1xf32> to vector<8x8xf32>
    %10 = arith.subf %6, %9 : vector<8x8xf32>
    %11 = arith.truncf %10 : vector<8x8xf32> to vector<8x8xbf16>
    %12 = math.exp %11 : vector<8x8xbf16>
    %13 = arith.extf %12 : vector<8x8xbf16> to vector<8x8xf32>
    %cst_4 = arith.constant dense<0.000000e+00> : vector<8xf32>
    %14 = vector.multi_reduction <add>, %13, %cst_4 [1] : vector<8x8xf32> to vector<8xf32>
    %15 = vector.shape_cast %14 : vector<8xf32> to vector<8x1xf32>
    %c0_5 = arith.constant 0 : index
    %c0_6 = arith.constant 0 : index
    %c0_7 = arith.constant 0 : index
    %16 = vector.load %arg4[%c0_5, %c0_6, %c0_7] : memref<1x8x32xbf16, #tpu.memory_space<vmem>>, vector<1x8x32xbf16>
    %17 = vector.shape_cast %16 : vector<1x8x32xbf16> to vector<8x32xbf16>
    %cst_8 = arith.constant dense<0.000000e+00> : vector<8x32xf32>
    %18 = tpu.matmul %12, %17, %cst_8 {dimension_numbers = #tpu.dot_dimension_numbers<[1], [0], [0], [1], [0, 0, 1, 1], [], []>} : vector<8x8xbf16>, vector<8x32xbf16>, vector<8x32xf32> -> vector<8x32xf32>
    %19 = tpu.reciprocal %15 : vector<8x1xf32> -> vector<8x1xf32>
    %20 = vector.broadcast %19 : vector<8x1xf32> to vector<8x32xf32>
    %21 = arith.mulf %18, %20 : vector<8x32xf32>
    %c0_9 = arith.constant 0 : index
    %c0_10 = arith.constant 0 : index
    %c0_11 = arith.constant 0 : index
    %22 = vector.load %arg5[%c0_9, %c0_10, %c0_11] : memref<1x8x32xf32, #tpu.memory_space<vmem>>, vector<1x8x32xf32>
    %23 = vector.shape_cast %22 : vector<1x8x32xf32> to vector<8x32xf32>
    %24 = vector.shape_cast %21 : vector<8x32xf32> to vector<1x8x32xf32>
    tpu.vector_store %arg5[%c0_9, %c0_10, %c0_11], %24 {strides = array<i32>} : memref<1x8x32xf32, #tpu.memory_space<vmem>>, vector<1x8x32xf32>,
    return
  }
  func.func @transform_0(%arg0: i32, %arg1: i32) -> (i32, i32) {
    %c0_i32 = arith.constant 0 : i32
    %c0_i32_0 = arith.constant 0 : i32
    %c0_i32_1 = arith.constant 0 : i32
    return %c0_i32, %c0_i32_0 : i32, i32
  }
  func.func @transform_1(%arg0: i32, %arg1: i32) -> (i32, i32, i32) {
    %c0_i32 = arith.constant 0 : i32
    %c0_i32_0 = arith.constant 0 : i32
    %c0_i32_1 = arith.constant 0 : i32
    return %arg0, %c0_i32, %c0_i32_0 : i32, i32, i32
  }
  func.func @transform_2(%arg0: i32, %arg1: i32) -> (i32, i32, i32) {
    %c0_i32 = arith.constant 0 : i32
    %c0_i32_0 = arith.constant 0 : i32
    %c0_i32_1 = arith.constant 0 : i32
    return %arg0, %c0_i32, %c0_i32_0 : i32, i32, i32
  }
  func.func @transform_3(%arg0: i32, %arg1: i32) -> (i32, i32, i32) {
    %c0_i32 = arith.constant 0 : i32
    %c0_i32_0 = arith.constant 0 : i32
    return %arg0, %arg1, %c0_i32 : i32, i32, i32
  }
}

</mosaic_0001>

<bundles_post_ra>
// kernel: tpu_custom_call.1
= control target key start
LH: loop header
LB: loop body
LE: loop exit
PB: predicated region body
PF: predicated region fallthrough
CT: control target
= control target key end

     0   :  { %8 = vsyncpa [#allocation3], 0  ;;  %s937_s0 = inlined_call_operand.hbm [shape: bf16[8,32], index: 0, kind: input, shape index: {}]   ;;  %s938_s1 = inlined_call_operand.hbm [shape: bf16[2,8,32], index: 1, kind: input, shape index: {}]   ;;  %s939_s2 = inlined_call_operand.hbm [shape: bf16[2,8,32], index: 2, kind: input, shape index: {}]   ;;  %s940_s3 = inlined_call_operand.hbm [shape: f32[2,8,32], index: 3, kind: output, shape index: {}]  }
   0x1   :  { %9 = vsyncpa [#allocation6], 0 }
   0x2   :  { %11 = vsyncpa [#allocation6 + $0x1], 0 }
   0x3   :  { %12 = vsyncpa [#allocation4], 0 }
   0x4   :  { %14 = vsyncpa [#allocation4 + $0x1], 0  ;;  %s763_s12 = smov 0   ;;  %s765_s13 = smov 0  }
   0x5   :  { %s767_s14 = smov 0   ;;  %s769_s15 = smov 0  }
   0x6   :  { %s771_s16 = smov 0   ;;  %s773_s17 = smov 0  }
   0x7 LB: > { %s32_s18 = sadd.s32 1, %s736_s16  ;;  %s60_s19 = sadd.s32 1, %s728_s14  ;;  %s740_s17 = sphi %s773_s17, %s20_s17   ;;  %s736_s16 = sphi %s771_s16, %s951_s16   ;;  %s732_s15 = sphi %s769_s15, %s950_s15   ;;  %s728_s14 = sphi %s767_s14, %s949_s14   ;;  %s724_s13 = sphi %s765_s13, %s948_s13   ;;  %s720_s12 = sphi %s763_s12, %s947_s12  }
   0x8   : > { %p34_p0 = scmp.ge.s32.totalorder %s32_s18, 2  ;;  %p67_p1 = scmp.ne.s32.totalorder %s728_s14, %s724_s13 }
   0x9   : > { %p68_p2 = scmp.eq.s32.totalorder %s740_s17, 0  ;;  %p466_p3 = scmp.ge.s32.totalorder %s740_s17, 2 }
   0xa   : > { %s953_s18 = smov (%p34_p0, %s32_s18), 0  ;;  %p508_p5 = scmp.lt.s32.totalorder %s740_s17, 2 }
   0xb   : > { %p804_p4 = por %p68_p2, %p67_p1  ;;  %s57_s21 = ssub.s32 %s736_s16, %s953_s18 }
   0xc   : > { %s163_s22 = sand.u32 1, %s740_s17   ;;  %p58_p6 = scmp.eq.s32.totalorder %s57_s21, 0 }
   0xd   : > { %s165_s23 = sand.u32 1, %s728_s14   ;;  %s468_s24 = sshll.u32 %s736_s16, 2 }
   0xe   : > { %s815_s25 = scalar_select %p58_p6, %s728_s14, %s60_s19  }
   0xf   : > { %s817_s26 = sshll.u32 %s165_s23, 2  ;;  %s171_s29 = scalar_lea.hbm %s938_s1, %s468_s24 }
  0x10   : > { %s173_s30 = sshll.u32 %s171_s29, 4  ;;  %s167_s4 = scalar_lea.vmem [#allocation5], %s817_s26  ;;  %s174_s30 = int_to_ptr.hbm [resolvable:$true] %s173_s30 }
  0x11   : > { %s175_s5 = sshll.u32 %s167_s4, 4  ;;  %p827_p7 = pnand %p508_p5, %p804_p4  ;;  %s176_s5 = int_to_ptr.vmem [resolvable:$true] %s175_s5 }
  0x12   : > { %s190_s9 = scalar_lea.hbm %s939_s2, %s468_s24  ;;  %s164_s10 = scalar_lea.sflag [#allocation6], %s163_s22 }
  0x13   : > { %499 = dma.hbm_to_vmem [thread:$0]  (!%p827_p7), %s174_s30, 64, %s176_s5, %s164_s10  }
  0x14   : > { %s837_s11 = sadd.s32 4294967295, %s740_s17   ;;  %s463_s19 = sadd.s32 4294967294, %s740_s17  }
  0x15   : > { %p73_p8 = scmp.ne.s32.totalorder %s724_s13, %s720_s12  ;;  %p74_p9 = scmp.eq.s32.totalorder %s837_s11, 0 }
  0x16   : > { %p125_p10 = scmp.eq.s32.totalorder %s837_s11, 1  ;;  %p131_p11 = scmp.eq.s32.totalorder %s463_s19, 1 }
  0x17   : > { %p464_p12 = scmp.ge.s32.totalorder %s740_s17, 1  ;;  %p847_p13 = por %p74_p9, %p73_p8 }
  0x18   : > { %p854_p0 = por %p125_p10, %p67_p1  ;;  %p858_p2 = por %p131_p11, %p73_p8 }
  0x19   : > { %p138_p4 = scmp.lt.s32.totalorder %s740_s17, 3  ;;  %s150_s28 = sshll.u32 %s937_s0, 4  ;;  %s151_s28 = int_to_ptr.hbm [resolvable:$true] %s150_s28 }
  0x1a   : > { %s192_s29 = sshll.u32 %s190_s9, 4  ;;  %s742_s30 = smov [#allocation2]   ;;  %s193_s29 = int_to_ptr.hbm [resolvable:$true] %s192_s29 }
  0x1b   : > { %p863_p5 = pnand %p464_p12, %p138_p4  ;;  %s152_s4 = sshll.u32 %s742_s30, 4  ;;  %s153_s4 = int_to_ptr.vmem [resolvable:$true] %s152_s4 }
  0x1c   : > { %s186_s5 = scalar_lea.vmem [#allocation7], %s817_s26 }
  0x1d   : > { %p492_p1 = pneg %p863_p5  ;;  %s194_s7 = sshll.u32 %s186_s5, 4  ;;  %s195_s7 = int_to_ptr.vmem [resolvable:$true] %s194_s7 }
  0x1e   : > { %502 = dma.hbm_to_vmem [thread:$0]  (!%p827_p7), %s193_s29, 64, %s195_s7, %s164_s10  }
  0x1f   : > { %p493_p6 = pnand %p492_p1, %p74_p9  ;;  %203 = sbr.rel (%p863_p5) target bundleno = 451 (0x1c3), region = 32 }
  0x21   : > { %495 = dma.hbm_to_vmem [thread:$0]  (!%p493_p6), %s151_s28, 64, %s153_s4, [#allocation3]  }
  0x24   : > { %707 = dma.done.wait (%p74_p9), [#allocation3], 64  }
  0x25   : > { %709 = vsyncadd (%p74_p9), [#allocation3], 4294967232  ;;  %s210_s8 = sand.u32 1, %s837_s11   ;;  %s885_s26 = sand.u32 1, %s724_s13  }
  0x26   : > { %s473_s9 = sshll.u32 %s885_s26, 2  ;;  %s211_s19 = scalar_lea.sflag [#allocation6], %s210_s8 }
  0x27   : > { %s214_s6 = scalar_lea.vmem [#allocation5], %s473_s9 }
  0x28   : > { %711 = dma.done.wait (%p847_p13), %s211_s19, 128  }
  0x29   : > { %713 = vsyncadd (%p847_p13), %s211_s19, 4294967168  ;;  %vm261_vm0 = vcmask 261120   ;;  %v260_v0 = vld [vmem:[%s214_s6] sm:$0xf]  ;;  %v259_v2 = vld [vmem:[#allocation2] sm:$0xf] }
  0x2a   : > { %v266_v1 = vsel %vm261_vm0, %v260_v0, 0  ;;  %vm281_vm1 = vcmask 64512   ;;  %s224_s10 = scalar_lea.vmem [#allocation7], %s473_s9  ;;  %vm299_vm2 = vcmask 1043456   ;;  %s475_s11 = sshll.u32 %s885_s26, 3 }
  0x2b   : > { %275 = vmatpush.bf16.xpose.msra.mxu0 %v266_v1  ;;  %v295_v6 = vld [vmem:[%s224_s10] sm:$0xf]  ;;  %s479_s20 = sshll.u32 %s732_s15, 3  ;;  %s252_s28 = scalar_lea.vmem [#allocation8], %s475_s11 }
  0x2c   : > { %v301_v7 = vsel %vm299_vm2, %v295_v6, 0  ;;  %s344_s27 = scalar_lea.hbm %s940_s3, %s479_s20  ;;  %s346_s29 = sshll.u32 %s252_s28, 4  ;;  %s347_s29 = int_to_ptr.vmem [resolvable:$true] %s346_s29 }
  0x2d   : > { %310 = vmatpush.bf16.msra.mxu1 %v301_v7  ;;  %s348_s30 = sshll.u32 %s344_s27, 4  ;;  %s333_s15 = scalar_lea.sflag [#allocation4], %s885_s26  ;;  %s349_s30 = int_to_ptr.hbm [resolvable:$true] %s348_s30 }
  0x2e   : > { %s668_s4 = sshra.s32 %s349_s30, 4  ;;  %s674_s9 = scalar_lea.hbm %s940_s3, 16  ;;  %s669_s4 = int_to_ptr.hbm [resolvable:$true] %s668_s4 }
  0x2f   : > { %s670_s5 = scalar_lea.hbm %s669_s4, 8  ;;  %p675_p10 = scmp.lt.s32.totalorder %s669_s4, %s940_s3 }
  0x30   : > { %p671_p7 = scmp.ne.s32.totalorder %s669_s4, %s670_s5  ;;  %p676_p11 = scmp.lt.s32.totalorder %s674_s9, %s670_s5 }
  0x32   : > { %476 = vmatmul.msk.bf16.vlgmr.msra.gmra.mxu0 %vm261_vm0, %v259_v2  ;;  %p672_p8 = pnand %p671_p7, %p854_p0  ;;  %p677_p12 = por %p676_p11, %p675_p10 }
  0x34   : > { %p673_p9 = pneg %p672_p8 }
  0x36   : > { %p678_p13 = pnand %p677_p12, %p673_p9 }
  0xaf   : > { %v277_v3 = vpop.f32.mrf.mxu0 }
  0xb0   : > { %v282_v4 = vsel %vm281_vm1, %v277_v3, -inf }
  0xb1   : > { %283 = vmax.xlane.f32.xlu0 %v282_v4 }
  0xb7   : > { %v279_v5 = vpop.f32.mrf.mxu0 }
 0x124   : > { %v284_v8 = vpop.xlane.xlu0 %283 }
 0x125   : > { %v285_v9 = vsub.f32 %v277_v3, %v284_v8 }
 0x127   : > { %v286_v10 = vpack.c.bf16 %v285_v9, %v285_v9 }
 0x129   : > { %v287_v11 = vunpack.c.l.bf16 %v286_v10 }
 0x12b   : > { %v288_v12 = vmul.f32 1.442695, %v287_v11 }
 0x12d   : > { %560 = vpow2.f32 %v288_v12 }
 0x133   : > { %v561_v13 = vpop.eup %560 }
 0x134   : > { %v290_v14 = vpack.c.bf16 %v561_v13, %v561_v13 }
 0x136   : > { %477 = vmatmul.msk.bf16.vlgmr.msra.gmra.mxu1 %vm281_vm1, %v290_v14  ;;  %v291_v15 = vunpack.c.l.bf16 %v290_v14 }
 0x138   : > { %v292_v16 = vsel %vm281_vm1, %v291_v15, 0.0 }
 0x139   : > { %293 = vadd.xlane.f32.xlu0 %v292_v16 }
 0x1ac   : > { %v294_v17 = vpop.xlane.xlu0 %293 }
 0x1ad   : > { %562 = vrcp.f32 %v294_v17  ;;  %v327_v22 = vand.u32 2147483648, %v294_v17  ;;  %v325_v24 = vand.u32 2147483647, %v294_v17  ;;  %vm321_vm4 = vweird.f32 %v294_v17 }
 0x1af   : > { %v328_v26 = vor.u32 1.1754944e-38, %v327_v22  ;;  %vm326_vm6 = vcmp.eq.f32.partialorder %v325_v24, 8.507059e+37 }
 0x1b3   : > { %v563_v18 = vpop.eup %562  ;;  %v312_v19 = vpop.f32.mrf.mxu1 }
 0x1b4   : > { %v317_v20 = vmul.f32 %v563_v18, %v294_v17  ;;  %vm322_vm3 = vweird.f32 %v563_v18 }
 0x1b5   : > { %vm323_vm5 = vmor %vm321_vm4, %vm322_vm3 }
 0x1b6   : > { %v318_v21 = vsub.f32 1.0, %v317_v20 }
 0x1b8   : > { %v319_v23 = vmul.f32 %v563_v18, %v318_v21 }
 0x1ba   : > { %v320_v25 = vadd.f32 %v563_v18, %v319_v23 }
 0x1bb   : > { %v314_v27 = vpop.f32.mrf.mxu1 }
 0x1bc   : > { %v324_v28 = vsel %vm323_vm5, %v563_v18, %v320_v25 }
 0x1bd   : > { %v329_v29 = vsel %vm326_vm6, %v328_v26, %v324_v28 }
 0x1be   : > { %v330_v30 = vmul.f32 %v329_v29, %v312_v19 }
 0x1c0   : > { %331 = vst.msk [vmem:[%s252_s28] sm:$0xff] %vm261_vm0, %v330_v30 }
 0x1c1   : > { %681 = shalt.err (!%p678_p13)
}
 0x1c2   : > { %490 = dma.vmem_to_hbm [thread:$0]  (%p854_p0), %s347_s29, 128, %s349_s30, %s333_s15  }
 0x1c3 PF: > { %s360_s26 = sand.u32 1, %s720_s12   ;;  %p504_p4 = pnand %p466_p3, %p858_p2 }
 0x1c4   : > { %s361_s10 = scalar_lea.sflag [#allocation4], %s360_s26 }
 0x1c5   : > { %p505_p5 = pneg %p504_p4 }
 0x1c7   : > { %715 = dma.done.wait (%p505_p5), %s361_s10, 128  }
 0x1c8   : > { %717 = vsyncadd (%p505_p5), %s361_s10, 4294967168  ;;  %s20_s17 = sadd.s32 1, %s740_s17   ;;  %s947_s12 = smov %s724_s13 }
 0x1c9   : > { %p17_p1 = scmp.ge.s32.totalorder %s20_s17, 4   ;;  %s948_s13 = smov %s728_s14 }
 0x1ca   : > { %s949_s14 = smov %s815_s25  ;;  %s950_s15 = smov %s736_s16 }
 0x1cb   : > { %s951_s16 = smov %s953_s18  ;;  %19 = sbr.rel (!%p17_p1) target bundleno = 7 (0x7), region = 94 }
 0x1d0   :  { %367 = vsyncpa [#allocation3], 1 }
 0x1d1   :  { %369 = vsyncpa [#allocation3 + $0x1], 1 }
 0x1d2   :  { %370 = vsyncpa [#allocation6], 1 }
 0x1d3   :  { %372 = vsyncpa [#allocation6 + $0x1], 1 }
 0x1d4   :  { %373 = vsyncpa [#allocation4], 1 }
 0x1d5   :  { %375 = vsyncpa [#allocation4 + $0x1], 1 }

</bundles_post_ra>
